<compile_context>
chip_gen: v6e
topology: v6e:2x2x1
jax: 0.10.0
libtpu: 0.0.40
codegen_flags: <defaults>
</compile_context>

<pallas_src>
import functools

import jax
import jax.numpy as jnp
from jax.experimental import pallas as pl
from jax.experimental.pallas import tpu as pltpu


def _round_up(x, m):
    return ((x + m - 1) // m) * m


def _vmem_capacity_bytes():
    """Per-TensorCore VMEM capacity; conservative fallback if the query fails."""
    try:
        return int(pltpu.get_tpu_info().vmem_capacity_bytes)
    except Exception:
        return 64 * 1024 * 1024  # v7x-sized fallback: always safe


def _lm_criterion_kernel(inp_ref, tgt_ref, msk_ref, out_ref, *, n_rows, vocab):
    # inp_ref: (TR, TV) log-prob tile in its NATIVE dtype (block (i, j))
    # tgt_ref: (TR, 1)  i32 target indices       (resident across vocab axis j)
    # msk_ref: (TR, 1)  f32 mask                 (resident across vocab axis j)
    # out_ref: (TR, 1)  f32 per-row partial sums (resident across vocab axis j)
    i = pl.program_id(0)
    j = pl.program_id(1)

    @pl.when(j == 0)
    def _():
        out_ref[...] = jnp.zeros_like(out_ref)

    logp = inp_ref[...]                                    # (TR, TV) native dtype
    tgt = tgt_ref[...]                                     # (TR, 1) i32
    msk = msk_ref[...]                                     # (TR, 1) f32

    tr, tv = logp.shape

    # Row validity for the ragged last row block (the big input is NOT padded,
    # so out-of-bounds rows contain stale VMEM -- possibly NaN -- and must be
    # excluded before any arithmetic, not just multiplied by 0).
    row = jax.lax.broadcasted_iota(jnp.int32, (tr, 1), 0) + i * tr
    valid = row < n_rows                                   # (TR, 1) bool

    # Fold row validity + target range into the *local* target index so the
    # big (TR, TV) select stays a single compare + select (cheap, per-element).
    in_range = valid & (tgt >= 0) & (tgt < vocab)
    tgt_local = jnp.where(in_range, tgt - j * tv, -1)      # (TR, 1); -1 never matches

    col = jax.lax.broadcasted_iota(jnp.int32, (tr, tv), 1)  # (TR, TV)
    picked = jnp.where(col == tgt_local, logp, jnp.zeros((), dtype=logp.dtype))

    # At most one non-zero per row; adding zeros is exact in any float dtype,
    # so reduce in the native dtype and only cast the (TR, 1) result to f32.
    row_sum = jnp.sum(picked, axis=1, keepdims=True).astype(jnp.float32)
    msk_eff = jnp.where(valid, msk, 0.0)                   # (TR, 1)

    out_ref[...] += -row_sum * msk_eff


@functools.partial(jax.jit, static_argnames=("TR", "TV", "vmem_limit"))
def _lm_criterion_call(inp, target, mask, *, TR, TV, vmem_limit):
    B, T, V = inp.shape
    N = B * T

    # Cheap (N, 1) side arrays; the big input stays untouched (view reshape).
    tgt_flat = target[:, :T].astype(jnp.int32).reshape(N, 1)
    msk_flat = mask[:, :T].astype(jnp.float32).reshape(N, 1)
    inp_flat = inp.reshape(N, V)                           # native dtype, no copy

    # Denominator computed in the wrapper (no second resident accumulator).
    den = jnp.sum(msk_flat)

    grid = (pl.cdiv(N, TR), pl.cdiv(V, TV))

    kernel = functools.partial(_lm_criterion_kernel, n_rows=N, vocab=V)

    cost = pl.CostEstimate(
        flops=2 * N * V,
        transcendentals=0,
        bytes_accessed=N * V * inp.dtype.itemsize + 3 * N * 4,
    )

    partial_sums = pl.pallas_call(
        kernel,
        out_shape=jax.ShapeDtypeStruct((N, 1), jnp.float32),
        grid_spec=pltpu.PrefetchScalarGridSpec(
            num_scalar_prefetch=0,
            grid=grid,
            in_specs=[
                pl.BlockSpec((TR, TV), lambda i, j: (i, j)),
                pl.BlockSpec((TR, 1), lambda i, j: (i, 0)),
                pl.BlockSpec((TR, 1), lambda i, j: (i, 0)),
            ],
            out_specs=pl.BlockSpec((TR, 1), lambda i, j: (i, 0)),
        ),
        compiler_params=pltpu.CompilerParams(
            # Row blocks are independent -> "parallel" (sharded across the two
            # TensorCores on v7x); vocab axis is the reduction -> "arbitrary",
            # and it is last in the grid.
            dimension_semantics=("parallel", "arbitrary"),
            vmem_limit_bytes=vmem_limit,
        ),
        cost_estimate=cost,
    )(inp_flat, tgt_flat, msk_flat)

    return (jnp.sum(partial_sums) / den).astype(jnp.float32)


def language_model_criterion(inp, target, mask, *, row_tile=256):
    """inp: (B, T, V) log-probs (any float dtype), target: (B, Tt>=T) int,
    mask: (B, Tt>=T) float. Returns scalar f32 loss."""
    B, T, V = inp.shape
    N = B * T
    itemsize = jnp.dtype(inp.dtype).itemsize

    # Row tile: multiple of 16 (safe for bf16 packing), shrunk for small inputs.
    TR = min(row_tile, _round_up(N, 16))
    TR = _round_up(TR, 16)

    # Generation-dependent VMEM budget for the double-buffered input stream.
    vmem_cap = _vmem_capacity_bytes()
    if vmem_cap >= 96 * 1024 * 1024:       # v5e / v6e: 128 MiB VMEM per core
        input_db_budget = 32 * 1024 * 1024
        vmem_limit = 64 * 1024 * 1024
    else:                                  # v7x: 64 MiB VMEM per core
        input_db_budget = 16 * 1024 * 1024
        vmem_limit = 48 * 1024 * 1024

    per_buffer = input_db_budget // 2
    tv_cap = max(128, (per_buffer // (TR * itemsize)) // 128 * 128)
    # Full-vocab block when it fits (single contiguous DMA per row block,
    # block last dim == full array dim is allowed even if not a multiple of
    # 128); otherwise lane-dense multiple-of-128 vocab blocks with a ragged
    # last block handled by the in-kernel iota compare.
    TV = V if V <= tv_cap else tv_cap

    return _lm_criterion_call(inp, target, mask, TR=TR, TV=TV,
                              vmem_limit=vmem_limit)


def _reference(inp, target, mask):
    B, T, V = inp.shape
    target = target[:, :T]
    mask = mask[:, :T].astype(jnp.float32)
    picked = jnp.take_along_axis(inp, target[..., None], axis=2)[..., 0]
    return jnp.sum(-picked.astype(jnp.float32) * mask) / jnp.sum(mask)


if __name__ == "__main__":
    key = jax.random.PRNGKey(0)
    B, T, V = 2, 8, 32
    Tt = T + 2  # target / mask longer than input seq, as the module allows

    k1, k2, k3 = jax.random.split(key, 3)
    logits = jax.random.normal(k1, (B, T, V), dtype=jnp.float32)
    inp = jax.nn.log_softmax(logits, axis=-1)
    target = jax.random.randint(k2, (B, Tt), 0, V, dtype=jnp.int32)
    mask = (jax.random.uniform(k3, (B, Tt)) > 0.3).astype(jnp.float32)
    # ensure mask is not all-zero over the used region
    mask = mask.at[0, 0].set(1.0)

    # f32 path
    loss = jax.block_until_ready(language_model_criterion(inp, target, mask))
    ref = jax.block_until_ready(_reference(inp, target, mask))
    assert jnp.allclose(loss, ref, atol=1e-5, rtol=1e-5), (loss, ref)

    # native bf16 streaming path (no wrapper-side upcast)
    inp_bf16 = inp.astype(jnp.bfloat16)
    loss_bf = jax.block_until_ready(language_model_criterion(inp_bf16, target, mask))
    ref_bf = jax.block_until_ready(_reference(inp_bf16, target, mask))
    assert jnp.allclose(loss_bf, ref_bf, atol=1e-3, rtol=1e-3), (loss_bf, ref_bf)

    print("KERNEL_OK")
</pallas_src>

<mosaic_0001>
module attributes {stable_mosaic.version = 11 : i64} {
  func.func @_lm_criterion_kernel(%arg0: i32, %arg1: i32, %arg2: memref<16x32xf32, #tpu.memory_space<vmem>>, %arg3: memref<16x1xi32, #tpu.memory_space<vmem>>, %arg4: memref<16x1xf32, #tpu.memory_space<vmem>>, %arg5: memref<16x1xf32, #tpu.memory_space<vmem>>) attributes {dimension_semantics = [#tpu.dimension_semantics<parallel>, #tpu.dimension_semantics<arbitrary>], iteration_bounds = array<i64: 1, 1>, scalar_prefetch = 0 : i64, scratch_operands = 0 : i64, tpu.core_type = #tpu.core_type<tc>, window_params = [{transform_indices = @transform_0, window_bounds = array<i64: 16, 32>}, {transform_indices = @transform_1, window_bounds = array<i64: 16, 1>}, {transform_indices = @transform_2, window_bounds = array<i64: 16, 1>}, {transform_indices = @transform_3, window_bounds = array<i64: 16, 1>}]} {
    %c0_i32 = arith.constant 0 : i32
    %0 = arith.cmpi eq, %arg1, %c0_i32 : i32
    %1 = arith.extui %0 : i1 to i32
    %c0_i32_0 = arith.constant 0 : i32
    %2 = arith.cmpi ne, %1, %c0_i32_0 : i32
    scf.if %2 {
      %cst_16 = arith.constant 0.000000e+00 : f32
      %38 = vector.broadcast %cst_16 : f32 to vector<16x1xf32>
      %c0_17 = arith.constant 0 : index
      %c0_18 = arith.constant 0 : index
      %39 = vector.load %arg5[%c0_17, %c0_18] : memref<16x1xf32, #tpu.memory_space<vmem>>, vector<16x1xf32>
      tpu.vector_store %arg5[%c0_17, %c0_18], %38 {strides = array<i32>} : memref<16x1xf32, #tpu.memory_space<vmem>>, vector<16x1xf32>,
    } else {
    }
    %c0 = arith.constant 0 : index
    %c0_1 = arith.constant 0 : index
    %3 = vector.load %arg2[%c0, %c0_1] : memref<16x32xf32, #tpu.memory_space<vmem>>, vector<16x32xf32>
    %c0_2 = arith.constant 0 : index
    %c0_3 = arith.constant 0 : index
    %4 = vector.load %arg3[%c0_2, %c0_3] : memref<16x1xi32, #tpu.memory_space<vmem>>, vector<16x1xi32>
    %c0_4 = arith.constant 0 : index
    %c0_5 = arith.constant 0 : index
    %5 = vector.load %arg4[%c0_4, %c0_5] : memref<16x1xf32, #tpu.memory_space<vmem>>, vector<16x1xf32>
    %6 = tpu.iota {dimensions = array<i32: 0>} : vector<16x1xi32>
    %c16_i32 = arith.constant 16 : i32
    %7 = arith.muli %arg0, %c16_i32 : i32
    %8 = vector.broadcast %7 : i32 to vector<16x1xi32>
    %9 = arith.addi %6, %8 : vector<16x1xi32>
    %c16_i32_6 = arith.constant 16 : i32
    %10 = vector.broadcast %c16_i32_6 : i32 to vector<16x1xi32>
    %11 = arith.cmpi slt, %9, %10 : vector<16x1xi32>
    %c0_i32_7 = arith.constant 0 : i32
    %12 = vector.broadcast %c0_i32_7 : i32 to vector<16x1xi32>
    %13 = arith.cmpi sge, %4, %12 : vector<16x1xi32>
    %14 = arith.andi %11, %13 : vector<16x1xi1>
    %c32_i32 = arith.constant 32 : i32
    %15 = vector.broadcast %c32_i32 : i32 to vector<16x1xi32>
    %16 = arith.cmpi slt, %4, %15 : vector<16x1xi32>
    %17 = arith.andi %14, %16 : vector<16x1xi1>
    %c32_i32_8 = arith.constant 32 : i32
    %18 = arith.muli %arg1, %c32_i32_8 : i32
    %19 = vector.broadcast %18 : i32 to vector<16x1xi32>
    %20 = arith.subi %4, %19 : vector<16x1xi32>
    %c-1_i32 = arith.constant -1 : i32
    %21 = vector.broadcast %c-1_i32 : i32 to vector<16x1xi32>
    %22 = arith.select %17, %20, %21 : vector<16x1xi1>, vector<16x1xi32>
    %23 = tpu.iota {dimensions = array<i32: 1>} : vector<16x32xi32>
    %24 = vector.broadcast %22 : vector<16x1xi32> to vector<16x32xi32>
    %25 = arith.cmpi eq, %23, %24 : vector<16x32xi32>
    %cst = arith.constant 0.000000e+00 : f32
    %26 = vector.broadcast %cst : f32 to vector<16x32xf32>
    %27 = arith.select %25, %3, %26 : vector<16x32xi1>, vector<16x32xf32>
    %cst_9 = arith.constant dense<0.000000e+00> : vector<16xf32>
    %28 = vector.multi_reduction <add>, %27, %cst_9 [1] : vector<16x32xf32> to vector<16xf32>
    %29 = vector.shape_cast %28 : vector<16xf32> to vector<16x1xf32>
    %cst_10 = arith.constant 0.000000e+00 : f32
    %30 = vector.broadcast %cst_10 : f32 to vector<16x1xf32>
    %31 = arith.select %11, %5, %30 : vector<16x1xi1>, vector<16x1xf32>
    %c0_11 = arith.constant 0 : index
    %c0_12 = arith.constant 0 : index
    %32 = vector.load %arg5[%c0_11, %c0_12] : memref<16x1xf32, #tpu.memory_space<vmem>>, vector<16x1xf32>
    %cst_13 = arith.constant 0.000000e+00 : f32
    %33 = vector.broadcast %cst_13 : f32 to vector<16x1xf32>
    %34 = arith.subf %33, %29 : vector<16x1xf32>
    %35 = arith.mulf %34, %31 : vector<16x1xf32>
    %36 = arith.addf %32, %35 : vector<16x1xf32>
    %c0_14 = arith.constant 0 : index
    %c0_15 = arith.constant 0 : index
    %37 = vector.load %arg5[%c0_14, %c0_15] : memref<16x1xf32, #tpu.memory_space<vmem>>, vector<16x1xf32>
    tpu.vector_store %arg5[%c0_14, %c0_15], %36 {strides = array<i32>} : memref<16x1xf32, #tpu.memory_space<vmem>>, vector<16x1xf32>,
    return
  }
  func.func @transform_0(%arg0: i32, %arg1: i32) -> (i32, i32) {
    %c0_i32 = arith.constant 0 : i32
    return %arg0, %arg1 : i32, i32
  }
  func.func @transform_1(%arg0: i32, %arg1: i32) -> (i32, i32) {
    %c0_i32 = arith.constant 0 : i32
    %c0_i32_0 = arith.constant 0 : i32
    return %arg0, %c0_i32 : i32, i32
  }
  func.func @transform_2(%arg0: i32, %arg1: i32) -> (i32, i32) {
    %c0_i32 = arith.constant 0 : i32
    %c0_i32_0 = arith.constant 0 : i32
    return %arg0, %c0_i32 : i32, i32
  }
  func.func @transform_3(%arg0: i32, %arg1: i32) -> (i32, i32) {
    %c0_i32 = arith.constant 0 : i32
    %c0_i32_0 = arith.constant 0 : i32
    return %arg0, %c0_i32 : i32, i32
  }
}

</mosaic_0001>

<bundles_post_ra>
// kernel: _lm_criterion_call.1
= control target key start
LH: loop header
LB: loop body
LE: loop exit
PB: predicated region body
PF: predicated region fallthrough
CT: control target
= control target key end

     0   :  { %v89_v0 = vmov 0   ;;  %vm18_vm6 = vcmask 7168   ;;  %v90_v5 = vmov 0.0   ;;  %v50_v6 = vlaneseq  ;;  %s151_s1 = inlined_call_operand.vmem [shape: s32[16,1], index: 1, kind: input, shape index: {}]   ;;  %s152_s3 = inlined_call_operand.vmem [shape: f32[16,1], index: 3, kind: output, shape index: {}]   ;;  %s153_s0 = inlined_call_operand.vmem [shape: f32[16,32], index: 0, kind: input, shape index: {}]   ;;  %s154_s2 = inlined_call_operand.vmem [shape: f32[16,1], index: 2, kind: input, shape index: {}]  }
   0x1   :  { %88 = vset.pattern.permute.xlu0 %v89_v0  ;;  %v23_v1 = vld [vmem:[%s151_s1] sm:$0xff]  ;;  %v24_v2 = vld [vmem:[%s151_s1 + $0x8] sm:$0xff]  ;;  %19 = vst.msk [vmem:[%s152_s3] sm:$0xff] %vm18_vm6, %v90_v5  ;;  %20 = vst.msk [vmem:[%s152_s3 + $0x8] sm:$0xff] %vm18_vm6, %v90_v5  ;;  %vm62_vm7 = vcmask 261120  }
   0x2   :  { %vm36_vm0 = vcmp.ge.s32.totalorder %v23_v1, 0  ;;  %vm40_vm1 = vcmp.lt.s32.totalorder %v23_v1, 32  ;;  %vm37_vm2 = vcmp.ge.s32.totalorder %v24_v2, 0  ;;  %vm41_vm3 = vcmp.lt.s32.totalorder %v24_v2, 32  ;;  %v21_v8 = vld [vmem:[%s153_s0] sm:$0xff]  ;;  %v22_v12 = vld [vmem:[%s153_s0 + $0x8] sm:$0xff] }
   0x3   :  { %vm42_vm4 = vmand %vm36_vm0, %vm40_vm1  ;;  %v51_v7 = vand.u32 127, %v50_v6  ;;  %v25_v16 = vld [vmem:[%s154_s2] sm:$0xff]  ;;  %v26_v21 = vld [vmem:[%s154_s2 + $0x8] sm:$0xff] }
   0x4   :  { %v48_v3 = vsel %vm42_vm4, %v23_v1, 4294967295  ;;  %vm43_vm5 = vmand %vm37_vm2, %vm41_vm3 }
   0x5   :  { %53 = vperm.xlu0 %88, %v48_v3   ;;  %v49_v4 = vsel %vm43_vm5, %v24_v2, 4294967295 }
   0x8   :  { %v71_v19 = vld [vmem:[%s152_s3] sm:$0xff]  ;;  %v72_v25 = vld [vmem:[%s152_s3 + $0x8] sm:$0xff] }
   0x9   :  { %56 = vperm.xlu0 %88, %v49_v4  }
  0x80   :  { %v54_v9 = vpop.permute.xlu0 %53 }
  0x81   :  { %vm58_vm8 = vcmp.eq.s32.totalorder %v51_v7, %v54_v9 }
  0x82   :  { %v60_v10 = vsel %vm58_vm8, %v21_v8, 0.0 }
  0x83   :  { %v63_v11 = vsel %vm62_vm7, %v60_v10, 0.0 }
  0x84   :  { %v57_v13 = vpop.permute.xlu0 %56  ;;  %64 = vadd.xlane.f32.xlu1 %v63_v11 }
  0x85   :  { %vm59_vm9 = vcmp.eq.s32.totalorder %v51_v7, %v57_v13 }
  0x86   :  { %v61_v14 = vsel %vm59_vm9, %v22_v12, 0.0 }
  0x87   :  { %v66_v15 = vsel %vm62_vm7, %v61_v14, 0.0 }
  0x88   :  { %67 = vadd.xlane.f32.xlu1 %v66_v15 }
 0x10d   :  { %v65_v17 = vpop.xlane.xlu1 %64 }
 0x10e   :  { %v73_v18 = vsub.f32 0.0, %v65_v17 }
 0x110   :  { %v75_v20 = vmul.f32 %v73_v18, %v25_v16 }
 0x111   :  { %v68_v22 = vpop.xlane.xlu1 %67 }
 0x112   :  { %v77_v23 = vadd.f32 %v75_v20, %v71_v19  ;;  %v74_v24 = vsub.f32 0.0, %v68_v22 }
 0x114   :  { %80 = vst.msk [vmem:[%s152_s3] sm:$0xff] %vm18_vm6, %v77_v23  ;;  %v76_v26 = vmul.f32 %v74_v24, %v26_v21 }
 0x116   :  { %v78_v27 = vadd.f32 %v76_v26, %v72_v25 }
 0x118   :  { %81 = vst.msk [vmem:[%s152_s3 + $0x8] sm:$0xff] %vm18_vm6, %v78_v27 }

</bundles_post_ra>
